<compile_context>
chip_gen: v7x
topology: tpu7x:2x2x1
jax: 0.10.0
libtpu: 0.0.40
codegen_flags: <defaults>
</compile_context>

<pallas_src>
import functools

import jax
import jax.numpy as jnp
from jax.experimental import pallas as pl
from jax.experimental.pallas import tpu as pltpu


LOG_STD_MIN = -20.0
LOG_STD_MAX = 2.0

_LANE = 128      # TPU lane width; fused-head output padded to a multiple.
_TB_MAX = 1024   # rows per grid step; per-row VMEM cost is only a few KiB.


def _round_up(x, m):
    return ((x + m - 1) // m) * m


def _cdiv(a, b):
    return -(-a // b)


def _choose_tb(batch):
    """Pick the batch tile: minimize padding waste, keep sublane-aligned,
    and give the grid >= 2 programs on medium/large batches (v7x megacore)."""
    if batch <= 0:
        return 8
    n_tiles = _cdiv(batch, _TB_MAX)
    if n_tiles < 2 and batch >= 128:   # use both v7x TensorCores when worth it
        n_tiles = 2
    return _round_up(_cdiv(batch, n_tiles), 8)


# ----------------------------------------------------------------------------
# Kernel
# ----------------------------------------------------------------------------
def _gaussian_policy_kernel(
    x_ref,    # (TB, S)   bf16
    w1_ref,   # (S, H)    bf16
    b1_ref,   # (1, H)    f32
    w2_ref,   # (H, H)    bf16
    b2_ref,   # (1, H)    f32
    wh_ref,   # (H, HP)   bf16   fused [wm | ws | 0-pad]
    bh_ref,   # (1, HP)   f32    fused [bm | bs | 0-pad]
    lo_ref,   # (1, HP)   f32    [-inf ... | LOG_STD_MIN ... | -inf ...]
    hi_ref,   # (1, HP)   f32    [+inf ... | LOG_STD_MAX ... | +inf ...]
    out_ref,  # (TB, HP)  f32    fused [mean | clamped log_std | 0-pad]
):
    # fc1 + ReLU (bf16 MXU, f32 accumulate)
    h1 = jnp.dot(x_ref[...], w1_ref[...], preferred_element_type=jnp.float32)
    h1 = jnp.maximum(h1 + b1_ref[...], 0.0)

    # fc2 + ReLU
    h2 = jnp.dot(h1.astype(jnp.bfloat16), w2_ref[...],
                 preferred_element_type=jnp.float32)
    h2 = jnp.maximum(h2 + b2_ref[...], 0.0)

    # Fused heads: one matmul produces [mean | log_std | padding].
    heads = jnp.dot(h2.astype(jnp.bfloat16), wh_ref[...],
                    preferred_element_type=jnp.float32)
    heads = heads + bh_ref[...]

    # Clamp via precomputed per-lane bound rows (mean/pad lanes: +/-inf bounds
    # -> pass-through; log_std lanes: [-20, 2]).
    heads = jnp.minimum(jnp.maximum(heads, lo_ref[...]), hi_ref[...])

    out_ref[...] = heads.astype(out_ref.dtype)


# ----------------------------------------------------------------------------
# One-time parameter packing (do NOT call per forward)
# ----------------------------------------------------------------------------
def pack_params(params):
    """Pack PyTorch-layout params for the kernel. Call once (e.g. at init).

    params: dict with w1 (S,H), b1 (1,H), w2 (H,H), b2 (1,H),
            wm (H,A), bm (1,A), ws (H,A), bs (1,A); all float32.
    Returns a dict of device arrays consumed by gaussian_policy_forward.
    """
    action_dim = params["wm"].shape[1]
    head_width = _round_up(2 * action_dim, _LANE)
    pad_cols = head_width - 2 * action_dim

    w_heads = jnp.concatenate([params["wm"], params["ws"]], axis=1)  # (H, 2A)
    b_heads = jnp.concatenate([params["bm"], params["bs"]], axis=1)  # (1, 2A)
    if pad_cols:
        w_heads = jnp.pad(w_heads, ((0, 0), (0, pad_cols)))
        b_heads = jnp.pad(b_heads, ((0, 0), (0, pad_cols)))

    lo = jnp.full((1, head_width), -jnp.inf, jnp.float32)
    lo = lo.at[0, action_dim:2 * action_dim].set(LOG_STD_MIN)
    hi = jnp.full((1, head_width), jnp.inf, jnp.float32)
    hi = hi.at[0, action_dim:2 * action_dim].set(LOG_STD_MAX)

    return dict(
        w1=params["w1"].astype(jnp.bfloat16),
        b1=params["b1"].astype(jnp.float32),
        w2=params["w2"].astype(jnp.bfloat16),
        b2=params["b2"].astype(jnp.float32),
        wh=w_heads.astype(jnp.bfloat16),
        bh=b_heads.astype(jnp.float32),
        lo=lo,
        hi=hi,
    )


# ----------------------------------------------------------------------------
# Forward (jitted; packed params are cached arrays, no per-call repacking)
# ----------------------------------------------------------------------------
@functools.partial(jax.jit, static_argnames=("action_dim",))
def gaussian_policy_forward(x, packed, *, action_dim):
    """GaussianPolicy forward pass in one Pallas kernel.

    Args:
      x: (batch, state_dim) float32 (or bfloat16).
      packed: output of pack_params().
      action_dim: number of actions (static).

    Returns:
      (mean, log_std), each (batch, action_dim) float32.
    """
    batch, state_dim = x.shape
    hidden_dim = packed["w1"].shape[1]
    head_width = packed["wh"].shape[1]

    # Batch tiling.
    tb = _choose_tb(batch)
    b_pad = _round_up(batch, tb)
    x_bf16 = x.astype(jnp.bfloat16)
    if b_pad != batch:
        x_bf16 = jnp.pad(x_bf16, ((0, b_pad - batch), (0, 0)))
    grid = (b_pad // tb,)

    in_specs = [
        pl.BlockSpec((tb, state_dim), lambda i: (i, 0)),           # x
        pl.BlockSpec((state_dim, hidden_dim), lambda i: (0, 0)),   # w1
        pl.BlockSpec((1, hidden_dim), lambda i: (0, 0)),           # b1
        pl.BlockSpec((hidden_dim, hidden_dim), lambda i: (0, 0)),  # w2
        pl.BlockSpec((1, hidden_dim), lambda i: (0, 0)),           # b2
        pl.BlockSpec((hidden_dim, head_width), lambda i: (0, 0)),  # wh
        pl.BlockSpec((1, head_width), lambda i: (0, 0)),           # bh
        pl.BlockSpec((1, head_width), lambda i: (0, 0)),           # lo
        pl.BlockSpec((1, head_width), lambda i: (0, 0)),           # hi
    ]
    out_specs = pl.BlockSpec((tb, head_width), lambda i: (i, 0))
    out_shape = jax.ShapeDtypeStruct((b_pad, head_width), jnp.float32)

    out = pl.pallas_call(
        _gaussian_policy_kernel,
        grid=grid,
        in_specs=in_specs,
        out_specs=out_specs,
        out_shape=out_shape,
        compiler_params=pltpu.CompilerParams(
            dimension_semantics=("parallel",)),
    )(x_bf16, packed["w1"], packed["b1"], packed["w2"], packed["b2"],
      packed["wh"], packed["bh"], packed["lo"], packed["hi"])

    mean = out[:batch, :action_dim]
    log_std = out[:batch, action_dim:2 * action_dim]
    return mean, log_std


# ----------------------------------------------------------------------------
# Init + reference
# ----------------------------------------------------------------------------
def init_params(key, state_dim, action_dim, hidden_dim=256):
    """Mimics PyTorch default Linear init (uniform +/- 1/sqrt(fan_in)).
    Weights stored (in_features, out_features)."""
    def linear(k, fan_in, fan_out):
        kw, kb = jax.random.split(k)
        bound = 1.0 / jnp.sqrt(jnp.float32(fan_in))
        w = jax.random.uniform(kw, (fan_in, fan_out), jnp.float32, -bound, bound)
        b = jax.random.uniform(kb, (1, fan_out), jnp.float32, -bound, bound)
        return w, b

    k1, k2, k3, k4 = jax.random.split(key, 4)
    w1, b1 = linear(k1, state_dim, hidden_dim)
    w2, b2 = linear(k2, hidden_dim, hidden_dim)
    wm, bm = linear(k3, hidden_dim, action_dim)
    ws, bs = linear(k4, hidden_dim, action_dim)
    return dict(w1=w1, b1=b1, w2=w2, b2=b2, wm=wm, bm=bm, ws=ws, bs=bs)


def _reference_forward(x, p):
    """Pure-JAX reference of the same math, mimicking the kernel's bf16
    weight/activation rounding (f32 accumulation) for a tight comparison."""
    def bf(a):
        return a.astype(jnp.bfloat16).astype(jnp.float32)

    h1 = jnp.maximum(
        jnp.dot(bf(x), bf(p["w1"]), preferred_element_type=jnp.float32)
        + p["b1"], 0.0)
    h2 = jnp.maximum(
        jnp.dot(bf(h1), bf(p["w2"]), preferred_element_type=jnp.float32)
        + p["b2"], 0.0)
    mean = jnp.dot(bf(h2), bf(p["wm"]), preferred_element_type=jnp.float32) + p["bm"]
    log_std = jnp.dot(bf(h2), bf(p["ws"]), preferred_element_type=jnp.float32) + p["bs"]
    log_std = jnp.clip(log_std, LOG_STD_MIN, LOG_STD_MAX)
    return mean, log_std


if __name__ == "__main__":
    # Small shapes consistent with the module: state-vector input, MLP policy.
    state_dim = 16
    action_dim = 8
    hidden_dim = 256

    key = jax.random.PRNGKey(0)
    k_params, k_x1, k_x2 = jax.random.split(key, 3)
    params = init_params(k_params, state_dim, action_dim, hidden_dim)
    packed = pack_params(params)  # one-time packing, reused across calls
    packed = jax.block_until_ready(packed)

    def check(batch, k):
        x = jax.random.normal(k, (batch, state_dim), jnp.float32)
        mean, log_std = gaussian_policy_forward(x, packed, action_dim=action_dim)
        jax.block_until_ready((mean, log_std))
        ref_mean, ref_log_std = _reference_forward(x, params)
        assert mean.shape == (batch, action_dim)
        assert log_std.shape == (batch, action_dim)
        assert jnp.allclose(mean, ref_mean, atol=2e-3, rtol=2e-3), \
            float(jnp.max(jnp.abs(mean - ref_mean)))
        assert jnp.allclose(log_std, ref_log_std, atol=2e-3, rtol=2e-3), \
            float(jnp.max(jnp.abs(log_std - ref_log_std)))

    check(8, k_x1)     # tiny batch: single tile
    check(300, k_x2)   # awkward batch: 2 parallel tiles (v7x megacore path)

    # TODO(synk): the stochastic `sample()` method (rsample/tanh/log_prob) is
    # sampling logic outside forward(); not implemented in this kernel.

    print("KERNEL_OK")
</pallas_src>

<mosaic_0001>
module attributes {stable_mosaic.version = 11 : i64} {
  func.func @_gaussian_policy_kernel(%arg0: i32, %arg1: memref<8x16xbf16, #tpu.memory_space<vmem>>, %arg2: memref<16x256xbf16, #tpu.memory_space<vmem>>, %arg3: memref<1x256xf32, #tpu.memory_space<vmem>>, %arg4: memref<256x256xbf16, #tpu.memory_space<vmem>>, %arg5: memref<1x256xf32, #tpu.memory_space<vmem>>, %arg6: memref<256x128xbf16, #tpu.memory_space<vmem>>, %arg7: memref<1x128xf32, #tpu.memory_space<vmem>>, %arg8: memref<1x128xf32, #tpu.memory_space<vmem>>, %arg9: memref<1x128xf32, #tpu.memory_space<vmem>>, %arg10: memref<8x128xf32, #tpu.memory_space<vmem>>) attributes {dimension_semantics = [#tpu.dimension_semantics<parallel>], iteration_bounds = array<i64: 1>, scalar_prefetch = 0 : i64, scratch_operands = 0 : i64, tpu.core_type = #tpu.core_type<tc>, window_params = [{transform_indices = @transform_0, window_bounds = array<i64: 8, 16>}, {pipeline_mode = #tpu.pipeline_mode<synchronous>, transform_indices = @transform_1, window_bounds = array<i64: 16, 256>}, {pipeline_mode = #tpu.pipeline_mode<synchronous>, transform_indices = @transform_2, window_bounds = array<i64: 1, 256>}, {pipeline_mode = #tpu.pipeline_mode<synchronous>, transform_indices = @transform_3, window_bounds = array<i64: 256, 256>}, {pipeline_mode = #tpu.pipeline_mode<synchronous>, transform_indices = @transform_4, window_bounds = array<i64: 1, 256>}, {pipeline_mode = #tpu.pipeline_mode<synchronous>, transform_indices = @transform_5, window_bounds = array<i64: 256, 128>}, {pipeline_mode = #tpu.pipeline_mode<synchronous>, transform_indices = @transform_6, window_bounds = array<i64: 1, 128>}, {pipeline_mode = #tpu.pipeline_mode<synchronous>, transform_indices = @transform_7, window_bounds = array<i64: 1, 128>}, {pipeline_mode = #tpu.pipeline_mode<synchronous>, transform_indices = @transform_8, window_bounds = array<i64: 1, 128>}, {transform_indices = @transform_9, window_bounds = array<i64: 8, 128>}]} {
    %c0 = arith.constant 0 : index
    %c0_0 = arith.constant 0 : index
    %0 = vector.load %arg1[%c0, %c0_0] : memref<8x16xbf16, #tpu.memory_space<vmem>>, vector<8x16xbf16>
    %c0_1 = arith.constant 0 : index
    %c0_2 = arith.constant 0 : index
    %1 = vector.load %arg2[%c0_1, %c0_2] : memref<16x256xbf16, #tpu.memory_space<vmem>>, vector<16x256xbf16>
    %cst = arith.constant dense<0.000000e+00> : vector<8x256xf32>
    %2 = tpu.matmul %0, %1, %cst {dimension_numbers = #tpu.dot_dimension_numbers<[1], [0], [0], [1], [0, 0, 1, 1], [], []>} : vector<8x16xbf16>, vector<16x256xbf16>, vector<8x256xf32> -> vector<8x256xf32>
    %c0_3 = arith.constant 0 : index
    %c0_4 = arith.constant 0 : index
    %3 = vector.load %arg3[%c0_3, %c0_4] : memref<1x256xf32, #tpu.memory_space<vmem>>, vector<1x256xf32>
    %4 = vector.broadcast %3 : vector<1x256xf32> to vector<8x256xf32>
    %5 = arith.addf %2, %4 : vector<8x256xf32>
    %cst_5 = arith.constant 0.000000e+00 : f32
    %6 = vector.broadcast %cst_5 : f32 to vector<8x256xf32>
    %7 = arith.maximumf %5, %6 : vector<8x256xf32>
    %8 = arith.truncf %7 : vector<8x256xf32> to vector<8x256xbf16>
    %c0_6 = arith.constant 0 : index
    %c0_7 = arith.constant 0 : index
    %9 = vector.load %arg4[%c0_6, %c0_7] : memref<256x256xbf16, #tpu.memory_space<vmem>>, vector<256x256xbf16>
    %cst_8 = arith.constant dense<0.000000e+00> : vector<8x256xf32>
    %10 = tpu.matmul %8, %9, %cst_8 {dimension_numbers = #tpu.dot_dimension_numbers<[1], [0], [0], [1], [0, 0, 1, 1], [], []>} : vector<8x256xbf16>, vector<256x256xbf16>, vector<8x256xf32> -> vector<8x256xf32>
    %c0_9 = arith.constant 0 : index
    %c0_10 = arith.constant 0 : index
    %11 = vector.load %arg5[%c0_9, %c0_10] : memref<1x256xf32, #tpu.memory_space<vmem>>, vector<1x256xf32>
    %12 = vector.broadcast %11 : vector<1x256xf32> to vector<8x256xf32>
    %13 = arith.addf %10, %12 : vector<8x256xf32>
    %cst_11 = arith.constant 0.000000e+00 : f32
    %14 = vector.broadcast %cst_11 : f32 to vector<8x256xf32>
    %15 = arith.maximumf %13, %14 : vector<8x256xf32>
    %16 = arith.truncf %15 : vector<8x256xf32> to vector<8x256xbf16>
    %c0_12 = arith.constant 0 : index
    %c0_13 = arith.constant 0 : index
    %17 = vector.load %arg6[%c0_12, %c0_13] : memref<256x128xbf16, #tpu.memory_space<vmem>>, vector<256x128xbf16>
    %cst_14 = arith.constant dense<0.000000e+00> : vector<8x128xf32>
    %18 = tpu.matmul %16, %17, %cst_14 {dimension_numbers = #tpu.dot_dimension_numbers<[1], [0], [0], [1], [0, 0, 1, 1], [], []>} : vector<8x256xbf16>, vector<256x128xbf16>, vector<8x128xf32> -> vector<8x128xf32>
    %c0_15 = arith.constant 0 : index
    %c0_16 = arith.constant 0 : index
    %19 = vector.load %arg7[%c0_15, %c0_16] : memref<1x128xf32, #tpu.memory_space<vmem>>, vector<1x128xf32>
    %20 = vector.broadcast %19 : vector<1x128xf32> to vector<8x128xf32>
    %21 = arith.addf %18, %20 : vector<8x128xf32>
    %c0_17 = arith.constant 0 : index
    %c0_18 = arith.constant 0 : index
    %22 = vector.load %arg8[%c0_17, %c0_18] : memref<1x128xf32, #tpu.memory_space<vmem>>, vector<1x128xf32>
    %23 = vector.broadcast %22 : vector<1x128xf32> to vector<8x128xf32>
    %24 = arith.maximumf %21, %23 : vector<8x128xf32>
    %c0_19 = arith.constant 0 : index
    %c0_20 = arith.constant 0 : index
    %25 = vector.load %arg9[%c0_19, %c0_20] : memref<1x128xf32, #tpu.memory_space<vmem>>, vector<1x128xf32>
    %26 = vector.broadcast %25 : vector<1x128xf32> to vector<8x128xf32>
    %27 = arith.minimumf %24, %26 : vector<8x128xf32>
    %c0_21 = arith.constant 0 : index
    %c0_22 = arith.constant 0 : index
    %28 = vector.load %arg10[%c0_21, %c0_22] : memref<8x128xf32, #tpu.memory_space<vmem>>, vector<8x128xf32>
    tpu.vector_store %arg10[%c0_21, %c0_22], %27 {strides = array<i32>} : memref<8x128xf32, #tpu.memory_space<vmem>>, vector<8x128xf32>,
    return
  }
  func.func @transform_0(%arg0: i32) -> (i32, i32) {
    %c0_i32 = arith.constant 0 : i32
    %c0_i32_0 = arith.constant 0 : i32
    return %arg0, %c0_i32 : i32, i32
  }
  func.func @transform_1(%arg0: i32) -> (i32, i32) {
    %c0_i32 = arith.constant 0 : i32
    %c0_i32_0 = arith.constant 0 : i32
    %c0_i32_1 = arith.constant 0 : i32
    return %c0_i32, %c0_i32_0 : i32, i32
  }
  func.func @transform_2(%arg0: i32) -> (i32, i32) {
    %c0_i32 = arith.constant 0 : i32
    %c0_i32_0 = arith.constant 0 : i32
    %c0_i32_1 = arith.constant 0 : i32
    return %c0_i32, %c0_i32_0 : i32, i32
  }
  func.func @transform_3(%arg0: i32) -> (i32, i32) {
    %c0_i32 = arith.constant 0 : i32
    %c0_i32_0 = arith.constant 0 : i32
    %c0_i32_1 = arith.constant 0 : i32
    return %c0_i32, %c0_i32_0 : i32, i32
  }
  func.func @transform_4(%arg0: i32) -> (i32, i32) {
    %c0_i32 = arith.constant 0 : i32
    %c0_i32_0 = arith.constant 0 : i32
    %c0_i32_1 = arith.constant 0 : i32
    return %c0_i32, %c0_i32_0 : i32, i32
  }
  func.func @transform_5(%arg0: i32) -> (i32, i32) {
    %c0_i32 = arith.constant 0 : i32
    %c0_i32_0 = arith.constant 0 : i32
    %c0_i32_1 = arith.constant 0 : i32
    return %c0_i32, %c0_i32_0 : i32, i32
  }
  func.func @transform_6(%arg0: i32) -> (i32, i32) {
    %c0_i32 = arith.constant 0 : i32
    %c0_i32_0 = arith.constant 0 : i32
    %c0_i32_1 = arith.constant 0 : i32
    return %c0_i32, %c0_i32_0 : i32, i32
  }
  func.func @transform_7(%arg0: i32) -> (i32, i32) {
    %c0_i32 = arith.constant 0 : i32
    %c0_i32_0 = arith.constant 0 : i32
    %c0_i32_1 = arith.constant 0 : i32
    return %c0_i32, %c0_i32_0 : i32, i32
  }
  func.func @transform_8(%arg0: i32) -> (i32, i32) {
    %c0_i32 = arith.constant 0 : i32
    %c0_i32_0 = arith.constant 0 : i32
    %c0_i32_1 = arith.constant 0 : i32
    return %c0_i32, %c0_i32_0 : i32, i32
  }
  func.func @transform_9(%arg0: i32) -> (i32, i32) {
    %c0_i32 = arith.constant 0 : i32
    %c0_i32_0 = arith.constant 0 : i32
    return %arg0, %c0_i32 : i32, i32
  }
}

</mosaic_0001>

<bundles_post_ra>
// kernel: gaussian_policy_forward.1
= control target key start
LH: loop header
LB: loop body
LE: loop exit
PB: predicated region body
PF: predicated region fallthrough
CT: control target
= control target key end

     0   :  { %14 = vsyncpa [#allocation3], 0  ;;  %s888_s0 = inlined_call_operand.vmem [shape: bf16[8,16], index: 0, kind: input, shape index: {}]   ;;  %s889_s1 = inlined_call_operand.vmem [shape: bf16[16,256], index: 1, kind: input, shape index: {}]   ;;  %s890_s2 = inlined_call_operand.vmem [shape: f32[1,256], index: 2, kind: input, shape index: {}]   ;;  %s891_s3 = inlined_call_operand.hbm [shape: bf16[256,256], index: 3, kind: input, shape index: {}]   ;;  %s892_s4 = inlined_call_operand.vmem [shape: f32[1,256], index: 4, kind: input, shape index: {}]   ;;  %s893_s5 = inlined_call_operand.hbm [shape: bf16[256,128], index: 5, kind: input, shape index: {}]   ;;  %s894_s6 = inlined_call_operand.vmem [shape: f32[1,128], index: 6, kind: input, shape index: {}]   ;;  %s895_s7 = inlined_call_operand.vmem [shape: f32[1,128], index: 7, kind: input, shape index: {}]   ;;  %s896_s8 = inlined_call_operand.vmem [shape: f32[1,128], index: 8, kind: input, shape index: {}]   ;;  %s897_s9 = inlined_call_operand.vmem [shape: f32[8,128], index: 9, kind: output, shape index: {}]  }
   0x1   :  { %15 = vsyncpa [#allocation5], 0  ;;  %s780_s30 = smov [#allocation2]   ;;  %s732_s13 = scalar_lea.hbm %s891_s3, 4096 }
   0x2   :  { %s27_s10 = sshll.u32 %s780_s30, 4  ;;  %p733_p0 = scmp.ne.s32.totalorder %s891_s3, %s732_s13  ;;  %s28_s10 = int_to_ptr.vmem [resolvable:$true] %s27_s10 }
   0x3   :  { %p736_p1 = scmp.lt.u32.totalorder %s732_s13, %s891_s3 }
   0x5   :  { %p738_p2 = pnand %p736_p1, %p733_p0 }
   0x7   :  { %741 = shalt.err (!%p738_p2)
}
   0x8   :  { %s742_s18 = scalar_lea.vmem %s28_s10, 4096  ;;  %p747_p4 = scmp.lt.s32.totalorder %s28_s10, %s28_s10 }
   0x9   :  { %p743_p3 = scmp.ne.s32.totalorder %s28_s10, %s742_s18  ;;  %p748_p5 = scmp.lt.s32.totalorder %s742_s18, %s742_s18 }
   0xb   :  { %p749_p6 = por %p748_p5, %p747_p4 }
   0xd   :  { %p750_p7 = pnand %p749_p6, %p743_p3 }
   0xf   :  { %753 = shalt.err (!%p750_p7)
}
  0x10   :  { %s781_s19 = smov 128   ;;  %s782_s20 = smov 8  }
  0x11   :  { %33 = dma.hbm_to_vmem [thread:$0]  %s891_s3, 4096, %s28_s10, [#allocation3], %s781_s19, %s781_s19, %s782_s20  }
  0x12   :  { %s783_s23 = smov [#allocation4]   ;;  %s754_s27 = scalar_lea.hbm %s893_s5, 2048 }
  0x13   :  { %s41_s24 = sshll.u32 %s783_s23, 4  ;;  %p755_p8 = scmp.ne.s32.totalorder %s893_s5, %s754_s27  ;;  %s42_s24 = int_to_ptr.vmem [resolvable:$true] %s41_s24 }
  0x14   :  { %p758_p9 = scmp.lt.u32.totalorder %s754_s27, %s893_s5 }
  0x16   :  { %p760_p10 = pnand %p758_p9, %p755_p8 }
  0x18   :  { %763 = shalt.err (!%p760_p10)
}
  0x19   :  { %s764_s12 = scalar_lea.vmem %s42_s24, 2048  ;;  %p769_p12 = scmp.lt.s32.totalorder %s42_s24, %s42_s24 }
  0x1a   :  { %p765_p11 = scmp.ne.s32.totalorder %s42_s24, %s764_s12  ;;  %p770_p13 = scmp.lt.s32.totalorder %s764_s12, %s764_s12 }
  0x1c   :  { %p771_p0 = por %p770_p13, %p769_p12 }
  0x1e   :  { %p772_p1 = pnand %p771_p0, %p765_p11 }
  0x20   :  { %775 = shalt.err (!%p772_p1)
}
  0x21   :  { %s784_s3 = smov 64   ;;  %s785_s10 = smov 4  }
  0x22   :  { %47 = dma.hbm_to_vmem [thread:$0]  %s893_s5, 2048, %s42_s24, [#allocation5], %s784_s3, %s784_s3, %s785_s10  }
  0x23   :  { %776 = dma.done.wait [#allocation3], 4096  }
  0x24   :  { %777 = vsyncadd [#allocation3], 4294963200 }
  0x25   :  { %778 = dma.done.wait [#allocation5], 2048  }
  0x26   :  { %779 = vsyncadd [#allocation5], 4294965248  ;;  %v786_v0 = vmov 0   ;;  %v665_v1 = vld [vmem:[%s889_s1 + $0x4] ss:$8 sps:$4 sm:$0xff]   ;;  %vm86_vm0 = vcmask 130048   ;;  %v66_v48 = vlaneseq }
  0x27   :  { %122 = vmatprep.mubr.bf16.mxu0 %v786_v0  ;;  %v667_v2 = vld [vmem:[%s889_s1] ss:$8 sps:$4 sm:$0xff]   ;;  %90 = vmatprep.subr.bf16.mxu0 %v665_v1  ;;  %v668_v4 = vld [vmem:[#allocation2 + $0x4] ss:$8 sps:$4 sm:$0xff]   ;;  %v671_v6 = vld [vmem:[#allocation2 + $0x14] ss:$8 sps:$4 sm:$0xff]  }
  0x28   :  { %v61_v3 = vld [vmem:[%s888_s0] sm:$0xf]  ;;  %91 = vmatpush1.bf16.msra.mxu0 %v667_v2  ;;  %339 = vmatprep.subr.bf16.mxu1 %v668_v4  ;;  %v673_v7 = vld [vmem:[#allocation2 + $0x10] ss:$8 sps:$4 sm:$0xff]   ;;  %v674_v8 = vld [vmem:[#allocation2 + $0x24] ss:$8 sps:$4 sm:$0xff]  }
  0x29   :  { %v670_v5 = vld [vmem:[#allocation2] ss:$8 sps:$4 sm:$0xff]   ;;  %v677_v10 = vld [vmem:[#allocation2 + $0x34] ss:$8 sps:$4 sm:$0xff]   ;;  %v679_v11 = vld [vmem:[#allocation2 + $0x30] ss:$8 sps:$4 sm:$0xff]  }
  0x2a   :  { %340 = vmatpush1.bf16.msra.mxu1 %v670_v5  ;;  %v676_v9 = vld [vmem:[#allocation2 + $0x20] ss:$8 sps:$4 sm:$0xff]   ;;  %v680_v12 = vld [vmem:[#allocation2 + $0x44] ss:$8 sps:$4 sm:$0xff]   ;;  %v683_v14 = vld [vmem:[#allocation2 + $0x54] ss:$8 sps:$4 sm:$0xff]  }
  0x2b   :  { %584 = vmatmul.mubr.msk.bf16.vlgmr.msra.gmra.mrb[0].mxu0 %vm86_vm0, %v61_v3  ;;  %341 = vmatprep.subr.bf16.mxu1 %v671_v6  ;;  %v682_v13 = vld [vmem:[#allocation2 + $0x40] ss:$8 sps:$4 sm:$0xff]   ;;  %v685_v15 = vld [vmem:[#allocation2 + $0x50] ss:$8 sps:$4 sm:$0xff]   ;;  %v686_v16 = vld [vmem:[#allocation2 + $0x64] ss:$8 sps:$4 sm:$0xff]  }
  0x2c   :  { %v688_v17 = vld [vmem:[#allocation2 + $0x60] ss:$8 sps:$4 sm:$0xff]   ;;  %v689_v18 = vld [vmem:[#allocation2 + $0x74] ss:$8 sps:$4 sm:$0xff]   ;;  %v691_v19 = vld [vmem:[#allocation2 + $0x70] ss:$8 sps:$4 sm:$0xff]  }
  0x2d   :  { %v692_v20 = vld [vmem:[#allocation2 + $0x84] ss:$8 sps:$4 sm:$0xff]   ;;  %v694_v21 = vld [vmem:[#allocation2 + $0x80] ss:$8 sps:$4 sm:$0xff]   ;;  %v695_v22 = vld [vmem:[#allocation2 + $0x94] ss:$8 sps:$4 sm:$0xff]  }
  0x2e   :  { %342 = vmatpush1.bf16.msra.mxu1 %v673_v7  ;;  %v697_v23 = vld [vmem:[#allocation2 + $0x90] ss:$8 sps:$4 sm:$0xff]   ;;  %v698_v24 = vld [vmem:[#allocation2 + $0xa4] ss:$8 sps:$4 sm:$0xff]   ;;  %v700_v25 = vld [vmem:[#allocation2 + $0xa0] ss:$8 sps:$4 sm:$0xff]  }
  0x2f   :  { %343 = vmatprep.subr.bf16.mxu1 %v674_v8  ;;  %v701_v26 = vld [vmem:[#allocation2 + $0xb4] ss:$8 sps:$4 sm:$0xff]   ;;  %v703_v27 = vld [vmem:[#allocation2 + $0xb0] ss:$8 sps:$4 sm:$0xff]   ;;  %v704_v28 = vld [vmem:[#allocation2 + $0xc4] ss:$8 sps:$4 sm:$0xff]  }
  0x30   :  { %v706_v29 = vld [vmem:[#allocation2 + $0xc0] ss:$8 sps:$4 sm:$0xff]   ;;  %v707_v30 = vld [vmem:[#allocation2 + $0xd4] ss:$8 sps:$4 sm:$0xff]   ;;  %v709_v31 = vld [vmem:[#allocation2 + $0xd0] ss:$8 sps:$4 sm:$0xff]  }
  0x31   :  { %v710_v32 = vld [vmem:[#allocation2 + $0xe4] ss:$8 sps:$4 sm:$0xff]   ;;  %v712_v33 = vld [vmem:[#allocation2 + $0xe0] ss:$8 sps:$4 sm:$0xff]   ;;  %v713_v34 = vld [vmem:[#allocation2 + $0xf4] ss:$8 sps:$4 sm:$0xff]  }
  0x32   :  { %344 = vmatpush1.bf16.msra.mxu1 %v676_v9  ;;  %v715_v35 = vld [vmem:[#allocation2 + $0xf0] ss:$8 sps:$4 sm:$0xff]   ;;  %v716_v36 = vld [vmem:[#allocation4 + $0x40] sm:$0xff]   ;;  %v718_v38 = vld [vmem:[#allocation4 + $0x48] sm:$0xff]   ;;  %v67_v49 = vshrl.u32 %v66_v48, 7 }
  0x33   :  { %345 = vmatprep.subr.bf16.mxu1 %v677_v10  ;;  %v717_v37 = vld [vmem:[#allocation4] sm:$0xff]   ;;  %636 = vmatprep.subr.bf16.mxu0 %v716_v36  ;;  %v719_v39 = vld [vmem:[#allocation4 + $0x8] sm:$0xff]   ;;  %v720_v40 = vld [vmem:[#allocation4 + $0x50] sm:$0xff]  }
  0x34   :  { %637 = vmatpush3.bf16.msra.mxu0 %v717_v37  ;;  %v721_v41 = vld [vmem:[#allocation4 + $0x10] sm:$0xff]   ;;  %v722_v42 = vld [vmem:[#allocation4 + $0x58] sm:$0xff]   ;;  %v724_v44 = vld [vmem:[#allocation4 + $0x60] sm:$0xff]   ;;  %v68_v50 = vsub.s32 0, %v67_v49  ;;  %v72_v52 = vsub.s32 1, %v67_v49 }
  0x35   :  { %638 = vmatprep.subr.bf16.mxu0 %v718_v38  ;;  %v723_v43 = vld [vmem:[#allocation4 + $0x18] sm:$0xff]   ;;  %v725_v45 = vld [vmem:[#allocation4 + $0x20] sm:$0xff]   ;;  %v726_v46 = vld [vmem:[#allocation4 + $0x68] sm:$0xff]  }
  0x36   :  { %346 = vmatpush1.bf16.msra.mxu1 %v679_v11  ;;  %v727_v47 = vld [vmem:[#allocation4 + $0x28] sm:$0xff]   ;;  %v64_v51 = vld [vmem:[%s890_s2] sm:$0x3]  ;;  %v728_v1 = vld [vmem:[#allocation4 + $0x70] sm:$0xff]  }
  0x37   :  { %347 = vmatprep.subr.bf16.mxu1 %v680_v12  ;;  %v69_v53 = vrot.slane %v64_v51, %v68_v50  ;;  %v73_v54 = vrot.slane %v64_v51, %v72_v52  ;;  %v729_v2 = vld [vmem:[#allocation4 + $0x30] sm:$0xff]   ;;  %v730_v3 = vld [vmem:[#allocation4 + $0x78] sm:$0xff]   ;;  %v167_v5 = vld [vmem:[%s892_s4] sm:$0x3] }
  0x38   :  { %639 = vmatpush3.bf16.msra.mxu0 %v719_v39  ;;  %v731_v4 = vld [vmem:[#allocation4 + $0x38] sm:$0xff]   ;;  %v172_v6 = vrot.slane %v167_v5, %v68_v50  ;;  %v176_v7 = vrot.slane %v167_v5, %v72_v52 }
  0x39   :  { %640 = vmatprep.subr.bf16.mxu0 %v720_v40 }
  0x3a   :  { %348 = vmatpush1.bf16.msra.mxu1 %v682_v13 }
  0x3b   :  { %349 = vmatprep.subr.bf16.mxu1 %v683_v14 }
  0x3c   :  { %641 = vmatpush3.bf16.msra.mxu0 %v721_v41 }
  0x3d   :  { %642 = vmatprep.subr.bf16.mxu0 %v722_v42 }
  0x3e   :  { %350 = vmatpush1.bf16.msra.mxu1 %v685_v15 }
  0x3f   :  { %351 = vmatprep.subr.bf16.mxu1 %v686_v16 }
  0x40   :  { %643 = vmatpush3.bf16.msra.mxu0 %v723_v43 }
  0x41   :  { %644 = vmatprep.subr.bf16.mxu0 %v724_v44 }
  0x42   :  { %352 = vmatpush1.bf16.msra.mxu1 %v688_v17 }
  0x43   :  { %353 = vmatprep.subr.bf16.mxu1 %v689_v18 }
  0x44   :  { %645 = vmatpush3.bf16.msra.mxu0 %v725_v45 }
  0x45   :  { %646 = vmatprep.subr.bf16.mxu0 %v726_v46 }
  0x46   :  { %354 = vmatpush1.bf16.msra.mxu1 %v691_v19  ;;  %v617_v19 = vld [vmem:[%s894_s6] ss:$0 sm:$0xff] }
  0x47   :  { %355 = vmatprep.subr.bf16.mxu1 %v692_v20 }
  0x48   :  { %647 = vmatpush3.bf16.msra.mxu0 %v727_v47 }
  0x49   :  { %648 = vmatprep.subr.bf16.mxu0 %v728_v1 }
  0x4a   :  { %356 = vmatpush1.bf16.msra.mxu1 %v694_v21 }
  0x4b   :  { %357 = vmatprep.subr.bf16.mxu1 %v695_v22 }
  0x4c   :  { %649 = vmatpush3.bf16.msra.mxu0 %v729_v2 }
  0x4d   :  { %650 = vmatprep.subr.bf16.mxu0 %v730_v3 }
  0x4e   :  { %358 = vmatpush1.bf16.msra.mxu1 %v697_v23  ;;  %v634_v23 = vld [vmem:[%s895_s7] ss:$0 sm:$0xff] }
  0x4f   :  { %359 = vmatprep.subr.bf16.mxu1 %v698_v24 }
  0x50   :  { %651 = vmatpush3.bf16.msra.mxu0 %v731_v4 }
  0x52   :  { %360 = vmatpush1.bf16.msra.mxu1 %v700_v25 }
  0x53   :  { %361 = vmatprep.subr.bf16.mxu1 %v701_v26  ;;  %v635_v26 = vld [vmem:[%s896_s8] ss:$0 sm:$0xff] }
  0x56   :  { %362 = vmatpush1.bf16.msra.mxu1 %v703_v27 }
  0x57   :  { %363 = vmatprep.subr.bf16.mxu1 %v704_v28 }
  0x5a   :  { %364 = vmatpush1.bf16.msra.mxu1 %v706_v29 }
  0x5b   :  { %365 = vmatprep.subr.bf16.mxu1 %v707_v30 }
  0x5e   :  { %366 = vmatpush1.bf16.msra.mxu1 %v709_v31 }
  0x5f   :  { %367 = vmatprep.subr.bf16.mxu1 %v710_v32 }
  0x62   :  { %368 = vmatpush1.bf16.msra.mxu1 %v712_v33 }
  0x63   :  { %369 = vmatprep.subr.bf16.mxu1 %v713_v34 }
  0x66   :  { %370 = vmatpush1.bf16.msra.mxu1 %v715_v35 }
  0xfe   :  { %v124_v55 = vpop.f32.mrb[0].mxu0 }
  0xff   :  { %v125_v56 = vadd.f32 %v124_v55, %v69_v53  ;;  %v126_v57 = vpop.f32.mrb[1].mxu0 }
 0x100   :  { %v127_v58 = vadd.f32 %v126_v57, %v73_v54  ;;  %v128_v59 = vpop.f32.mrb[2].mxu0 }
 0x101   :  { %v131_v60 = vmax.f32 %v125_v56, 0.0  ;;  %v129_v61 = vpop.f32.mrb[3].mxu0 }
 0x102   :  { %v132_v62 = vmax.f32 %v127_v58, 0.0 }
 0x103   :  { %v133_v0 = vpack.c.bf16 %v131_v60, %v131_v60 }
 0x104   :  { %v134_v63 = vpack.c.bf16 %v132_v62, %v132_v62 }
 0x106   :  { %371 = vmatprep.mubr.bf16.mxu1 %v134_v63 }
 0x107   :  { %372 = vmatmul.mubr.bf16.vlgmr.msra.gmra.mrb[0].mxu1 %v133_v0 }
 0x1da   :  { %v373_v8 = vpop.f32.mrb[0].mxu1 }
 0x1db   :  { %v374_v9 = vadd.f32 %v373_v8, %v172_v6  ;;  %v375_v10 = vpop.f32.mrb[1].mxu1 }
 0x1dc   :  { %v376_v11 = vadd.f32 %v375_v10, %v176_v7  ;;  %v377_v12 = vpop.f32.mrb[2].mxu1 }
 0x1dd   :  { %v380_v13 = vmax.f32 %v374_v9, 0.0  ;;  %v378_v14 = vpop.f32.mrb[3].mxu1 }
 0x1de   :  { %v381_v15 = vmax.f32 %v376_v11, 0.0 }
 0x1df   :  { %v382_v17 = vpack.c.bf16 %v380_v13, %v380_v13 }
 0x1e0   :  { %v383_v16 = vpack.c.bf16 %v381_v15, %v381_v15 }
 0x1e2   :  { %551 = vmatprep.mubr.bf16.mxu0 %v383_v16 }
 0x1e3   :  { %552 = vmatmul.mubr.bf16.vlgmr.msra.gmra.mrb[4].mxu0 %v382_v17 }
 0x2b6   :  { %v652_v18 = vpop.f32.mrb[4].mxu0 }
 0x2b7   :  { %v653_v20 = vpop.f32.mrb[5].mxu0 }
 0x2b8   :  { %v654_v21 = vadd.f32 %v653_v20, %v652_v18  ;;  %v655_v22 = vpop.f32.mrb[6].mxu0 }
 0x2b9   :  { %v656_v24 = vpop.f32.mrb[7].mxu0 }
 0x2ba   :  { %v554_v25 = vadd.f32 %v654_v21, %v617_v19 }
 0x2bc   :  { %v566_v27 = vmax.f32 %v554_v25, %v634_v23 }
 0x2be   :  { %v574_v28 = vmin.f32 %v566_v27, %v635_v26 }
 0x2c0   :  { %575 = vst [vmem:[%s897_s9] sm:$0xff] %v574_v28 }
 0x2c1   :  { %580 = vsyncpa [#allocation3], 1 }
 0x2c2   :  { %581 = vsyncpa [#allocation5], 1 }

</bundles_post_ra>
